<compile_context>
chip_gen: v7x
topology: tpu7x:2x2x1
jax: 0.10.0
libtpu: 0.0.40
codegen_flags: <defaults>
</compile_context>

<pallas_src>
import functools
import math

import jax
import jax.numpy as jnp
from jax.experimental import pallas as pl
from jax.experimental.pallas import tpu as pltpu


def _round_up(x, m):
    return ((x + m - 1) // m) * m


# --------------------------------------------------------------------------------------
# Fused matmul kernel:  out = act((A @ B) * scale + bias [+ residual])
#   A, B are bf16; accumulation is f32 directly in the resident output tile.
# --------------------------------------------------------------------------------------

def _make_matmul_kernel(activation, has_residual):
    def kernel(*refs):
        if has_residual:
            a_ref, b_ref, s_ref, c_ref, r_ref, o_ref = refs
        else:
            a_ref, b_ref, s_ref, c_ref, o_ref = refs

        k = pl.program_id(2)

        @pl.when(k == 0)
        def _():
            o_ref[...] = jnp.zeros_like(o_ref)

        o_ref[...] += jnp.dot(a_ref[...], b_ref[...],
                              preferred_element_type=jnp.float32)

        @pl.when(k == pl.num_programs(2) - 1)
        def _():
            y = o_ref[...] * s_ref[...] + c_ref[...]
            if has_residual:
                y = y + r_ref[...]
            if activation == "relu":
                y = jnp.maximum(y, 0.0)
            elif activation == "sigmoid":
                y = jax.nn.sigmoid(y)
            o_ref[...] = y

    return kernel


@functools.lru_cache(maxsize=None)
def _get_matmul_call(Mp, Kp, Np, tm, tk, tn, activation, has_residual):
    grid = (Mp // tm, Np // tn, Kp // tk)
    in_specs = [
        pl.BlockSpec((tm, tk), lambda i, j, k: (i, k)),
        pl.BlockSpec((tk, tn), lambda i, j, k: (k, j)),
        pl.BlockSpec((1, tn), lambda i, j, k: (0, j)),
        pl.BlockSpec((1, tn), lambda i, j, k: (0, j)),
    ]
    if has_residual:
        # Residual tile has the same block index as the output tile (resident across k).
        in_specs.append(pl.BlockSpec((tm, tn), lambda i, j, k: (i, j)))
    return pl.pallas_call(
        _make_matmul_kernel(activation, has_residual),
        out_shape=jax.ShapeDtypeStruct((Mp, Np), jnp.float32),
        grid_spec=pltpu.PrefetchScalarGridSpec(
            num_scalar_prefetch=0,
            grid=grid,
            in_specs=in_specs,
            out_specs=pl.BlockSpec((tm, tn), lambda i, j, k: (i, j)),
        ),
        compiler_params=pltpu.CompilerParams(
            dimension_semantics=("parallel", "parallel", "arbitrary")),
    )


def _choose_k_tiling(K):
    """Pick (tk, Kp) so padding waste stays small; single k-step when K is modest."""
    kp0 = _round_up(K, 128)
    if kp0 <= 2048:
        return kp0, kp0
    tk = 512
    return tk, _round_up(K, tk)


def _matmul_fused(a_bf16, cp, activation, residual_f32):
    """a_bf16:[M,K] @ pre-padded weight [Kp,Np]; scale/bias/activation/residual fused."""
    M, K = a_bf16.shape
    Kp, Np, tk, tn, N = cp["Kp"], cp["Np"], cp["tk"], cp["tn"], cp["N"]
    tm = min(128, _round_up(M, 8))
    Mp = _round_up(M, tm)

    if (Mp, Kp) != (M, K):
        a_p = jnp.zeros((Mp, Kp), jnp.bfloat16).at[:M, :K].set(a_bf16)
    else:
        a_p = a_bf16

    args = [a_p, cp["w"], cp["scale"], cp["bias"]]
    has_res = residual_f32 is not None
    if has_res:
        if (Mp, Np) != residual_f32.shape:
            r_p = jnp.zeros((Mp, Np), jnp.float32).at[:M, :N].set(residual_f32)
        else:
            r_p = residual_f32
        args.append(r_p)

    out = _get_matmul_call(Mp, Kp, Np, tm, tk, tn, activation, has_res)(*args)
    return out[:M, :N]


# --------------------------------------------------------------------------------------
# Conv / pooling wrappers (glue in plain JAX, compute in Pallas)
# --------------------------------------------------------------------------------------

def _im2col(x, kh, kw, stride, pad, pad_value=0.0):
    # x: [N, H, W, C] -> patches: [N*Ho*Wo, kh*kw*C]
    if pad > 0:
        x = jnp.pad(x, ((0, 0), (pad, pad), (pad, pad), (0, 0)),
                    constant_values=pad_value)
    N, Hp, Wp, C = x.shape
    Ho = (Hp - kh) // stride + 1
    Wo = (Wp - kw) // stride + 1
    cols = []
    for i in range(kh):
        for j in range(kw):
            cols.append(x[:, i:i + stride * Ho:stride, j:j + stride * Wo:stride, :])
    patches = jnp.stack(cols, axis=3)            # [N, Ho, Wo, kh*kw, C]
    return patches.reshape(N * Ho * Wo, kh * kw * C), (N, Ho, Wo)


def conv_bn_act(x, cp, activation="none", residual=None):
    """Conv2d (no bias) + eval-mode BN + activation (+ fused residual add before act)."""
    kh, kw, stride, pad = cp["kh"], cp["kw"], cp["stride"], cp["pad"]
    xb = x.astype(jnp.bfloat16)
    if kh == 1 and kw == 1 and pad == 0:
        # 1x1 conv: no im2col needed, just (strided) reshape.
        if stride > 1:
            xb = xb[:, ::stride, ::stride, :]
        N_, Ho, Wo, _ = xb.shape
        patches = xb.reshape(N_ * Ho * Wo, cp["cin"])
    else:
        # TODO(synk): 3x3/7x7 convs still materialize im2col patches in HBM; an in-kernel
        # window-offset accumulation over (kh,kw) would avoid the extra copy.
        patches, (N_, Ho, Wo) = _im2col(xb, kh, kw, stride, pad)

    res2 = None
    if residual is not None:
        res2 = residual.astype(jnp.float32).reshape(N_ * Ho * Wo, cp["cout"])
    y = _matmul_fused(patches, cp, activation, res2)
    return y.reshape(N_, Ho, Wo, cp["cout"])


@functools.lru_cache(maxsize=None)
def _get_reduce_call(R, M, C, op, dtype_name):
    # Window axis first -> the VMEM tile's last two dims (M, C) stay lane/sublane dense.
    in_dtype = jnp.dtype(dtype_name)
    out_dtype = jnp.float32 if op == "mean" else in_dtype

    def kernel(x_ref, o_ref):
        xv = x_ref[...]                          # (R, M, C)
        if op == "mean":
            acc = xv[0].astype(jnp.float32)
            for r in range(1, R):
                acc = acc + xv[r].astype(jnp.float32)
            acc = acc * (1.0 / R)
        else:
            acc = xv[0]
            for r in range(1, R):
                acc = jnp.maximum(acc, xv[r])
        o_ref[...] = acc.astype(o_ref.dtype)

    # NOTE: grid=(1,) whole-array blocks are fine at these small shapes; tile over M for
    # large inputs.
    return pl.pallas_call(
        kernel,
        out_shape=jax.ShapeDtypeStruct((M, C), out_dtype),
        grid=(1,),
        in_specs=[pl.BlockSpec((R, M, C), lambda i: (0, 0, 0))],
        out_specs=pl.BlockSpec((M, C), lambda i: (0, 0)),
    )


def maxpool_3x3_s2_p1(x):
    xb = x.astype(jnp.bfloat16)
    N, H, W, C = xb.shape
    # -3e38 is finite in bf16; every 3x3 window (pad=1) contains >=1 real element.
    xp = jnp.pad(xb, ((0, 0), (1, 1), (1, 1), (0, 0)), constant_values=-3.0e38)
    Ho = (H + 2 - 3) // 2 + 1
    Wo = (W + 2 - 3) // 2 + 1
    cols = [xp[:, i:i + 2 * Ho:2, j:j + 2 * Wo:2, :]
            for i in range(3) for j in range(3)]
    stk = jnp.stack(cols, axis=0).reshape(9, N * Ho * Wo, C)   # window axis first
    out = _get_reduce_call(9, N * Ho * Wo, C, "max", stk.dtype.name)(stk)
    return out.reshape(N, Ho, Wo, C)


def global_avgpool(x):
    N, H, W, C = x.shape
    if H * W == 1:                               # 1x1 spatial: avgpool is a reshape
        return x.reshape(N, C).astype(jnp.float32)
    xr = jnp.transpose(x.reshape(N, H * W, C), (1, 0, 2))      # (HW, N, C)
    return _get_reduce_call(H * W, N, C, "mean", jnp.dtype(x.dtype).name)(xr)


# --------------------------------------------------------------------------------------
# Fused 12-layer MLP head: one pallas_call, all bf16 weights resident in VMEM.
# --------------------------------------------------------------------------------------

def _head_kernel(x_ref, *refs):
    n = (len(refs) - 1) // 2
    w_refs = refs[:n]
    b_refs = refs[n:2 * n]
    o_ref = refs[2 * n]
    h = x_ref[...]                               # bf16, (Mp, 2048)
    for i in range(n):
        y = jnp.dot(h, w_refs[i][...], preferred_element_type=jnp.float32)
        y = y + b_refs[i][...]
        if i < n - 1:
            # Sigmoid; Dropout(0.5) is identity (eval-mode).
            h = jax.nn.sigmoid(y).astype(jnp.bfloat16)
        else:
            o_ref[...] = y


def mlp_head(feat, head):
    ws, bs, dims = head
    B = feat.shape[0]
    Mp = _round_up(B, 8)
    din0, _, din0p, _ = dims[0]
    x_p = jnp.zeros((Mp, din0p), jnp.bfloat16).at[:B, :din0].set(
        feat.astype(jnp.bfloat16))
    out_p = dims[-1][3]

    in_specs = [pl.BlockSpec(x_p.shape, lambda i: (0, 0))]
    in_specs += [pl.BlockSpec(w.shape, lambda i: (0, 0)) for w in ws]
    in_specs += [pl.BlockSpec(b.shape, lambda i: (0, 0)) for b in bs]

    out = pl.pallas_call(
        _head_kernel,
        out_shape=jax.ShapeDtypeStruct((Mp, out_p), jnp.float32),
        grid=(1,),
        in_specs=in_specs,
        out_specs=pl.BlockSpec((Mp, out_p), lambda i: (0, 0)),
        # Resident bf16 head weights ~7 MB (x2 buffers); 40 MiB is safe on v5e/v6e/v7x.
        compiler_params=pltpu.CompilerParams(vmem_limit_bytes=40 * 1024 * 1024),
    )(x_p, *ws, *bs)
    return out[:B, :dims[-1][1]]


# --------------------------------------------------------------------------------------
# Deterministic parameter init + one-time padding / bf16 conversion (hoisted to init)
# --------------------------------------------------------------------------------------

class _KeyGen:
    def __init__(self, key):
        self._key = key
        self._i = 0

    def __call__(self):
        self._i += 1
        return jax.random.fold_in(self._key, self._i)


def _init_conv(key, kh, kw, cin, cout):
    std = 1.0 / math.sqrt(kh * kw * cin)
    return jax.random.normal(key, (kh, kw, cin, cout), jnp.float32) * std


def _init_bn_folded(key, c, eps=1e-5):
    k1, k2, k3, k4 = jax.random.split(key, 4)
    gamma = 1.0 + 0.1 * jax.random.normal(k1, (c,), jnp.float32)
    beta = 0.1 * jax.random.normal(k2, (c,), jnp.float32)
    mean = 0.1 * jax.random.normal(k3, (c,), jnp.float32)
    var = 1.0 + 0.1 * jax.random.uniform(k4, (c,), jnp.float32)
    scale = gamma / jnp.sqrt(var + eps)
    bias = beta - mean * scale
    return scale, bias


def _prep_conv(w_hwio, bn_scale, bn_bias, stride, pad):
    """Reshape + pad weight to [Kp, Np] bf16 and pad folded BN scale/bias, once at init."""
    kh, kw, cin, cout = w_hwio.shape
    K, N = kh * kw * cin, cout
    tk, Kp = _choose_k_tiling(K)
    tn = 128                                     # small N-tiles -> >=2 tiles for megacore
    Np = _round_up(N, tn)
    w2 = jnp.zeros((Kp, Np), jnp.bfloat16).at[:K, :N].set(
        w_hwio.reshape(K, N).astype(jnp.bfloat16))
    s = jnp.zeros((1, Np), jnp.float32).at[0, :N].set(bn_scale.astype(jnp.float32))
    b = jnp.zeros((1, Np), jnp.float32).at[0, :N].set(bn_bias.astype(jnp.float32))
    return dict(w=w2, scale=s, bias=b, kh=kh, kw=kw, cin=cin, cout=cout,
                stride=stride, pad=pad, K=K, N=N, Kp=Kp, Np=Np, tk=tk, tn=tn)


def init_backbone(kg):
    p = {"conv1": _prep_conv(_init_conv(kg(), 7, 7, 3, 64),
                             *_init_bn_folded(kg(), 64), stride=2, pad=3)}
    layers_cfg = [(64, 3, 1), (128, 4, 2), (256, 6, 2), (512, 3, 2)]   # ResNet-50
    in_c = 64
    layers = []
    for width, nblocks, stride in layers_cfg:
        blocks = []
        for bi in range(nblocks):
            s = stride if bi == 0 else 1
            blk = {}
            blk["c1"] = _prep_conv(_init_conv(kg(), 1, 1, in_c, width),
                                   *_init_bn_folded(kg(), width), stride=1, pad=0)
            blk["c2"] = _prep_conv(_init_conv(kg(), 3, 3, width, width),
                                   *_init_bn_folded(kg(), width), stride=s, pad=1)
            blk["c3"] = _prep_conv(_init_conv(kg(), 1, 1, width, width * 4),
                                   *_init_bn_folded(kg(), width * 4), stride=1, pad=0)
            if bi == 0:                          # downsample branch
                blk["cd"] = _prep_conv(_init_conv(kg(), 1, 1, in_c, width * 4),
                                       *_init_bn_folded(kg(), width * 4),
                                       stride=s, pad=0)
            blocks.append(blk)
            in_c = width * 4
        layers.append(blocks)
    p["layers"] = layers
    return p


def init_head(kg):
    dims_list = [2048] + [512] * 10 + [64, 2]    # 2048->512, 512->512 x9, 512->64, 64->2
    ws, bs, dims = [], [], []
    for din, dout in zip(dims_list[:-1], dims_list[1:]):
        w = jax.random.normal(kg(), (din, dout), jnp.float32) / math.sqrt(din)
        b = 0.01 * jax.random.normal(kg(), (dout,), jnp.float32)
        dinp, doutp = _round_up(din, 128), _round_up(dout, 128)
        ws.append(jnp.zeros((dinp, doutp), jnp.bfloat16).at[:din, :dout].set(
            w.astype(jnp.bfloat16)))
        bs.append(jnp.zeros((1, doutp), jnp.float32).at[0, :dout].set(b))
        dims.append((din, dout, dinp, doutp))
    return ws, bs, dims


# --------------------------------------------------------------------------------------
# Forward pass
# --------------------------------------------------------------------------------------

def _bottleneck(x, blk):
    identity = x
    out = conv_bn_act(x, blk["c1"], activation="relu")
    out = conv_bn_act(out, blk["c2"], activation="relu")
    if "cd" in blk:
        identity = conv_bn_act(x, blk["cd"], activation="none")
    # Residual add + ReLU fused into conv3's matmul epilogue.
    return conv_bn_act(out, blk["c3"], activation="relu", residual=identity)


def resnet50_backbone(x_nhwc, bp):
    x = conv_bn_act(x_nhwc, bp["conv1"], activation="relu")
    x = maxpool_3x3_s2_p1(x)
    for layer in bp["layers"]:
        for blk in layer:
            x = _bottleneck(x, blk)
    return global_avgpool(x)                     # [N, 2048]


def discriminator_e2e_forward(params, x_nchw, nn_output, prediction, p_t, pass_sign):
    # PyTorch input is NCHW; convert to the kernels' NHWC layout.
    x = jnp.transpose(x_nchw.astype(jnp.float32), (0, 2, 3, 1))
    feat = resnet50_backbone(x, params["backbone"])
    feat = feat.reshape(-1, 2048)
    p = mlp_head(feat, params["head"])
    # TODO(synk): GradLayer forward is undefined in the reference source; treated as
    # identity on p (nn_output / prediction / p_t / pass_sign only affect gradients).
    del nn_output, prediction, p_t, pass_sign
    return p


# --------------------------------------------------------------------------------------
# Main
# --------------------------------------------------------------------------------------

if __name__ == "__main__":
    kg = _KeyGen(jax.random.PRNGKey(0))
    params = {"backbone": init_backbone(kg), "head": init_head(kg)}

    kx, k1, k2 = jax.random.split(jax.random.PRNGKey(0), 3)
    x = jax.random.normal(kx, (2, 3, 32, 32), jnp.float32)        # NCHW, like PyTorch
    nn_output = jax.random.normal(k1, (2, 2), jnp.float32)
    prediction = jax.random.normal(k2, (2, 2), jnp.float32)
    p_t = jnp.float32(0.5)
    pass_sign = jnp.int32(1)

    p = discriminator_e2e_forward(params, x, nn_output, prediction, p_t, pass_sign)
    p = jax.block_until_ready(p)

    assert p.shape == (2, 2), p.shape
    assert bool(jnp.all(jnp.isfinite(p)))
    print("KERNEL_OK")
</pallas_src>

<mosaic_0001>
module attributes {stable_mosaic.version = 11 : i64} {
  func.func @kernel(%arg0: i32, %arg1: i32, %arg2: i32, %arg3: memref<128x256xbf16, #tpu.memory_space<vmem>>, %arg4: memref<256x128xbf16, #tpu.memory_space<vmem>>, %arg5: memref<1x128xf32, #tpu.memory_space<vmem>>, %arg6: memref<1x128xf32, #tpu.memory_space<vmem>>, %arg7: memref<128x128xf32, #tpu.memory_space<vmem>>) attributes {dimension_semantics = [#tpu.dimension_semantics<parallel>, #tpu.dimension_semantics<parallel>, #tpu.dimension_semantics<arbitrary>], iteration_bounds = array<i64: 4, 1, 1>, scalar_prefetch = 0 : i64, scratch_operands = 0 : i64, tpu.core_type = #tpu.core_type<tc>, window_params = [{transform_indices = @transform_0, window_bounds = array<i64: 128, 256>}, {transform_indices = @transform_1, window_bounds = array<i64: 256, 128>}, {transform_indices = @transform_2, window_bounds = array<i64: 1, 128>}, {transform_indices = @transform_3, window_bounds = array<i64: 1, 128>}, {transform_indices = @transform_4, window_bounds = array<i64: 128, 128>}]} {
    %c0_i32 = arith.constant 0 : i32
    %0 = arith.cmpi eq, %arg2, %c0_i32 : i32
    %1 = arith.extui %0 : i1 to i32
    %c0_i32_0 = arith.constant 0 : i32
    %2 = arith.cmpi ne, %1, %c0_i32_0 : i32
    scf.if %2 {
      %cst_10 = arith.constant 0.000000e+00 : f32
      %12 = vector.broadcast %cst_10 : f32 to vector<128x128xf32>
      %c0_11 = arith.constant 0 : index
      %c0_12 = arith.constant 0 : index
      %13 = vector.load %arg7[%c0_11, %c0_12] : memref<128x128xf32, #tpu.memory_space<vmem>>, vector<128x128xf32>
      tpu.vector_store %arg7[%c0_11, %c0_12], %12 {strides = array<i32>} : memref<128x128xf32, #tpu.memory_space<vmem>>, vector<128x128xf32>,
    } else {
    }
    %c0 = arith.constant 0 : index
    %c0_1 = arith.constant 0 : index
    %3 = vector.load %arg7[%c0, %c0_1] : memref<128x128xf32, #tpu.memory_space<vmem>>, vector<128x128xf32>
    %c0_2 = arith.constant 0 : index
    %c0_3 = arith.constant 0 : index
    %4 = vector.load %arg3[%c0_2, %c0_3] : memref<128x256xbf16, #tpu.memory_space<vmem>>, vector<128x256xbf16>
    %c0_4 = arith.constant 0 : index
    %c0_5 = arith.constant 0 : index
    %5 = vector.load %arg4[%c0_4, %c0_5] : memref<256x128xbf16, #tpu.memory_space<vmem>>, vector<256x128xbf16>
    %cst = arith.constant dense<0.000000e+00> : vector<128x128xf32>
    %6 = tpu.matmul %4, %5, %cst {dimension_numbers = #tpu.dot_dimension_numbers<[1], [0], [0], [1], [0, 0, 1, 1], [], []>} : vector<128x256xbf16>, vector<256x128xbf16>, vector<128x128xf32> -> vector<128x128xf32>
    %7 = arith.addf %3, %6 : vector<128x128xf32>
    %c0_6 = arith.constant 0 : index
    %c0_7 = arith.constant 0 : index
    %8 = vector.load %arg7[%c0_6, %c0_7] : memref<128x128xf32, #tpu.memory_space<vmem>>, vector<128x128xf32>
    tpu.vector_store %arg7[%c0_6, %c0_7], %7 {strides = array<i32>} : memref<128x128xf32, #tpu.memory_space<vmem>>, vector<128x128xf32>,
    %c0_i32_8 = arith.constant 0 : i32
    %9 = arith.cmpi eq, %arg2, %c0_i32_8 : i32
    %10 = arith.extui %9 : i1 to i32
    %c0_i32_9 = arith.constant 0 : i32
    %11 = arith.cmpi ne, %10, %c0_i32_9 : i32
    scf.if %11 {
      %c0_10 = arith.constant 0 : index
      %c0_11 = arith.constant 0 : index
      %12 = vector.load %arg7[%c0_10, %c0_11] : memref<128x128xf32, #tpu.memory_space<vmem>>, vector<128x128xf32>
      %c0_12 = arith.constant 0 : index
      %c0_13 = arith.constant 0 : index
      %13 = vector.load %arg5[%c0_12, %c0_13] : memref<1x128xf32, #tpu.memory_space<vmem>>, vector<1x128xf32>
      %14 = vector.broadcast %13 : vector<1x128xf32> to vector<128x128xf32>
      %15 = arith.mulf %12, %14 : vector<128x128xf32>
      %c0_14 = arith.constant 0 : index
      %c0_15 = arith.constant 0 : index
      %16 = vector.load %arg6[%c0_14, %c0_15] : memref<1x128xf32, #tpu.memory_space<vmem>>, vector<1x128xf32>
      %17 = vector.broadcast %16 : vector<1x128xf32> to vector<128x128xf32>
      %18 = arith.addf %15, %17 : vector<128x128xf32>
      %cst_16 = arith.constant 0.000000e+00 : f32
      %19 = vector.broadcast %cst_16 : f32 to vector<128x128xf32>
      %20 = arith.maximumf %18, %19 : vector<128x128xf32>
      %c0_17 = arith.constant 0 : index
      %c0_18 = arith.constant 0 : index
      %21 = vector.load %arg7[%c0_17, %c0_18] : memref<128x128xf32, #tpu.memory_space<vmem>>, vector<128x128xf32>
      tpu.vector_store %arg7[%c0_17, %c0_18], %20 {strides = array<i32>} : memref<128x128xf32, #tpu.memory_space<vmem>>, vector<128x128xf32>,
    } else {
    }
    return
  }
  func.func @transform_0(%arg0: i32, %arg1: i32, %arg2: i32) -> (i32, i32) {
    %c0_i32 = arith.constant 0 : i32
    return %arg0, %arg2 : i32, i32
  }
  func.func @transform_1(%arg0: i32, %arg1: i32, %arg2: i32) -> (i32, i32) {
    %c0_i32 = arith.constant 0 : i32
    return %arg2, %arg1 : i32, i32
  }
  func.func @transform_2(%arg0: i32, %arg1: i32, %arg2: i32) -> (i32, i32) {
    %c0_i32 = arith.constant 0 : i32
    %c0_i32_0 = arith.constant 0 : i32
    return %c0_i32, %arg1 : i32, i32
  }
  func.func @transform_3(%arg0: i32, %arg1: i32, %arg2: i32) -> (i32, i32) {
    %c0_i32 = arith.constant 0 : i32
    %c0_i32_0 = arith.constant 0 : i32
    return %c0_i32, %arg1 : i32, i32
  }
  func.func @transform_4(%arg0: i32, %arg1: i32, %arg2: i32) -> (i32, i32) {
    %c0_i32 = arith.constant 0 : i32
    return %arg0, %arg1 : i32, i32
  }
}

</mosaic_0001>

<bundles_post_ra>
// kernel: tpu_custom_call.1
= control target key start
LH: loop header
LB: loop body
LE: loop exit
PB: predicated region body
PF: predicated region fallthrough
CT: control target
= control target key end

     0   :  { %9 = vsyncpa [#allocation3], 0  ;;  %s1666_s0 = inlined_call_operand.hbm [shape: bf16[512,256], index: 0, kind: input, shape index: {}]   ;;  %s1667_s1 = inlined_call_operand.hbm [shape: bf16[256,128], index: 1, kind: input, shape index: {}]   ;;  %s1668_s2 = inlined_call_operand.vmem [shape: f32[1,128], index: 2, kind: input, shape index: {}]   ;;  %s1669_s3 = inlined_call_operand.vmem [shape: f32[1,128], index: 3, kind: input, shape index: {}]   ;;  %s1670_s4 = inlined_call_operand.hbm [shape: f32[512,128], index: 4, kind: output, shape index: {}]  }
   0x1   :  { %11 = vsyncpa [#allocation3 + $0x1], 0 }
   0x2   :  { %12 = vsyncpa [#allocation6], 0 }
   0x3   :  { %13 = vsyncpa [#allocation4], 0 }
   0x4   :  { %15 = vsyncpa [#allocation4 + $0x1], 0  ;;  %s1366_s15 = smov 0   ;;  %s1368_s16 = smov 0  }
   0x5   :  { %s1370_s17 = smov 0   ;;  %s1372_s18 = smov 0  }
   0x6   :  { %s1374_s19 = smov 0   ;;  %s1376_s20 = smov 0  }
   0x7 LB: > { %s929_s21 = sadd.s32 4294967295, %s1330_s20   ;;  %s930_s22 = sadd.s32 4294967294, %s1330_s20   ;;  %s1330_s20 = sphi %s1376_s20, %s21_s20   ;;  %s1326_s19 = sphi %s1374_s19, %s1693_s19   ;;  %s1322_s18 = sphi %s1372_s18, %s1692_s18   ;;  %s1318_s17 = sphi %s1370_s17, %s1691_s17   ;;  %s1314_s16 = sphi %s1368_s16, %s1690_s16   ;;  %s1310_s15 = sphi %s1366_s15, %s1689_s15  }
   0x8   : > { %p62_p0 = scmp.ne.s32.totalorder %s1314_s16, %s1310_s15  ;;  %p1400_p1 = scmp.eq.s32.totalorder %s929_s21, 0 }
   0x9   : > { %p1404_p2 = scmp.eq.s32.totalorder %s929_s21, 3  ;;  %p174_p3 = scmp.eq.s32.totalorder %s930_s22, 3 }
   0xa   : > { %s1675_s23 = scalar_select %p1400_p1, 1, 0 }
   0xb   : > { %s1676_s24 = scalar_select %p1404_p2, 1, 0 }
   0xc   : > { %p1410_p4 = por %p1400_p1, %p62_p0  ;;  %p931_p5 = scmp.ge.s32.totalorder %s1330_s20, 1 }
   0xd   : > { %p1415_p6 = por %p174_p3, %p62_p0  ;;  %p181_p7 = scmp.lt.s32.totalorder %s1330_s20, 5 }
   0xe   : > { %s1677_s25 = scalar_select %p1410_p4, 1, 0 }
   0xf   : > { %s1678_s26 = scalar_select %p1415_p6, 1, 0 }
  0x10   : > { %p1420_p8 = pnand %p931_p5, %p181_p7  ;;  %s1332_s28 = smov [#allocation5]  }
  0x11   : > { %s197_s29 = sshll.u32 %s1332_s28, 4  ;;  %s40_s5 = sadd.s32 1, %s1326_s19  ;;  %s198_s29 = int_to_ptr.vmem [resolvable:$true] %s197_s29 }
  0x12   : > { %s1679_s27 = scalar_select %p1420_p8, 1, 0 }
  0x13   : > { %p1074_p9 = pneg %p1420_p8  ;;  %s1186_s8 = scalar_lea.hbm %s1667_s1, 2048 }
  0x14   : > { %p1187_p11 = scmp.ne.s32.totalorder %s1667_s1, %s1186_s8  ;;  %p1193_p3 = scmp.lt.u32.totalorder %s1186_s8, %s1667_s1 }
  0x15   : > { %p1428_p10 = pnand %p1074_p9, %p1400_p1 }
  0x17   : > { %p1188_p12 = pneg %p1428_p10 }
  0x19   : > { %p1189_p13 = pnand %p1188_p12, %p1187_p11 }
  0x1b   : > { %p1190_p0 = pneg %p1189_p13 }
  0x1d   : > { %p1195_p5 = pnand %p1193_p3, %p1190_p0 }
  0x1f   : > { %1198 = shalt.err (!%p1195_p5)
}
  0x20   : > { %s1199_s13 = scalar_lea.vmem %s198_s29, 2048  ;;  %p1207_p1 = scmp.lt.s32.totalorder %s198_s29, %s198_s29 }
  0x21   : > { %p1200_p7 = scmp.ne.s32.totalorder %s198_s29, %s1199_s13  ;;  %p1208_p4 = scmp.lt.s32.totalorder %s1199_s13, %s1199_s13 }
  0x23   : > { %p1202_p9 = pnand %p1200_p7, %p1188_p12  ;;  %p1209_p8 = por %p1208_p4, %p1207_p1 }
  0x25   : > { %p1203_p6 = pneg %p1202_p9 }
  0x27   : > { %p1210_p2 = pnand %p1209_p8, %p1203_p6 }
  0x29   : > { %1213 = shalt.err (!%p1210_p2)
}
  0x2a   : > { %s1333_s14 = smov 64   ;;  %s1334_s21 = smov 4  }
  0x2b   : > { %1077 = dma.hbm_to_vmem [thread:$0]  (!%p1428_p10), %s1667_s1, 2048, %s198_s29, [#allocation6], %s1333_s14, %s1333_s14, %s1334_s21  }
  0x2c   : > { %p42_p1 = scmp.ge.s32.totalorder %s40_s5, 4  ;;  %s49_s6 = sadd.s32 1, %s1318_s17 }
  0x2d   : > { %p56_p2 = scmp.ne.s32.totalorder %s1318_s17, %s1314_s16  ;;  %p57_p4 = scmp.eq.s32.totalorder %s1330_s20, 0 }
  0x2e   : > { %s1695_s5 = smov (%p42_p1, %s40_s5), 0  ;;  %p1682_p8 = scmp.ne.s32.totalorder %s1676_s24, 0 }
  0x2f   : > { %p1455_p6 = por %p57_p4, %p56_p2  ;;  %s44_s30 = ssub.s32 %s1326_s19, %s1695_s5 }
  0x30   : > { %p1461_p11 = por %p1682_p8, %p56_p2  ;;  %p1087_p12 = scmp.lt.s32.totalorder %s1330_s20, 4 }
  0x31   : > { %p47_p10 = scmp.eq.s32.totalorder %s44_s30, 0  ;;  %s223_s29 = sand.u32 1, %s1318_s17  }
  0x32   : > { %s936_s9 = sshll.u32 %s223_s29, 7  ;;  %s984_s11 = sshll.u32 %s1326_s19, 11 }
  0x33   : > { %s1470_s10 = scalar_select %p47_p10, %s1318_s17, %s49_s6  }
  0x34   : > { %s1476_s14 = scalar_lea.hbm %s1666_s0, %s984_s11  ;;  %s227_s24 = scalar_lea.vmem [#allocation2], %s936_s9 }
  0x35   : > { %s237_s21 = sshll.u32 %s227_s24, 4  ;;  %p1482_p13 = pnand %p1087_p12, %p1455_p6  ;;  %s1478_s21 = int_to_ptr.vmem [resolvable:$true] %s237_s21 }
  0x36   : > { %s1486_s28 = scalar_lea.sflag [#allocation3], %s223_s29  ;;  %s1214_s6 = scalar_lea.hbm %s1476_s14, 2048 }
  0x37   : > { %p1215_p0 = scmp.ne.s32.totalorder %s1476_s14, %s1214_s6  ;;  %p1216_p3 = pneg %p1482_p13 }
  0x38   : > { %s1219_s7 = scalar_lea.hbm %s1666_s0, 8192  ;;  %p1220_p9 = scmp.lt.u32.totalorder %s1476_s14, %s1666_s0 }
  0x39   : > { %p1217_p5 = pnand %p1216_p3, %p1215_p0  ;;  %p1221_p1 = scmp.lt.u32.totalorder %s1219_s7, %s1214_s6 }
  0x3a   : > { %p1223_p4 = scmp.lt.u32.totalorder %s1214_s6, %s1476_s14 }
  0x3b   : > { %p1218_p7 = pneg %p1217_p5  ;;  %p1222_p2 = por %p1221_p1, %p1220_p9 }
  0x3d   : > { %p1224_p6 = por %p1223_p4, %p1222_p2 }
  0x3f   : > { %p1225_p8 = pnand %p1224_p6, %p1218_p7 }
  0x41   : > { %1228 = shalt.err (!%p1225_p8)
}
  0x42   : > { %s1229_s29 = scalar_lea.vmem %s1478_s21, 2048  ;;  %s1335_s13 = smov [#allocation2]  }
  0x43   : > { %p1230_p12 = scmp.ne.s32.totalorder %s1478_s21, %s1229_s29  ;;  %s1234_s24 = sshll.u32 %s1335_s13, 4  ;;  %s1235_s24 = int_to_ptr.vmem [resolvable:$false] %s1234_s24 }
  0x44   : > { %s1236_s30 = scalar_lea.vmem %s1235_s24, 4096  ;;  %p1237_p5 = scmp.lt.s32.totalorder %s1478_s21, %s1235_s24 }
  0x45   : > { %p1232_p10 = pnand %p1230_p12, %p1216_p3  ;;  %p1238_p9 = scmp.lt.s32.totalorder %s1236_s30, %s1229_s29 }
  0x47   : > { %p1233_p0 = pneg %p1232_p10  ;;  %p1239_p1 = por %p1238_p9, %p1237_p5 }
  0x49   : > { %p1240_p2 = pnand %p1239_p1, %p1233_p0 }
  0x4b   : > { %1243 = shalt.err (!%p1240_p2)
}
  0x4c   : > { %s1336_s6 = smov 128   ;;  %s1337_s9 = smov 8  }
  0x4d   : > { %1081 = dma.hbm_to_vmem [thread:$0]  (!%p1482_p13), %s1476_s14, 2048, %s1478_s21, %s1486_s28, %s1336_s6, %s1336_s6, %s1337_s9  }
  0x4e   : > { %p1685_p3 = scmp.ne.s32.totalorder %s1679_s27, 0 }
  0x4f   : > { %s1517_s7 = sand.u32 (!%p1685_p3), 1, %s1314_s16   ;;  %p1686_p7 = scmp.ne.s32.totalorder (!%p1685_p3), %s1677_s25, 0 }
  0x50   : > { %249 = sbr.rel (%p1685_p3) target bundleno = 386 (0x182), region = 36  ;;  %s941_s11 = sshll.u32 (!%p1685_p3), %s1517_s7, 7 }
  0x51   : > { %s252_s12 = scalar_lea.sflag (!%p1685_p3), [#allocation3], %s1517_s7  ;;  %s1523_s29 = scalar_lea.vmem (!%p1685_p3), [#allocation2], %s941_s11 }
  0x57   : > { %1297 = dma.done.wait (%p1686_p7), %s252_s12, 2048  }
  0x58   : > { %1299 = vsyncadd (%p1686_p7), %s252_s12, 4294965248  ;;  %p1687_p13 = scmp.ne.s32.totalorder %s1675_s23, 0 }
  0x5a   : > { %1301 = dma.done.wait (%p1687_p13), [#allocation6], 2048  }
  0x5b   : > { %1303 = vsyncadd (%p1687_p13), [#allocation6], 4294965248  ;;  %v1146_v0 = vld [vmem:[#allocation5 + $0x40] sm:$0xff]   ;;  %v1148_v2 = vld [vmem:[#allocation5 + $0x48] sm:$0xff]   ;;  %s1569_s21 = scalar_lea.vmem [#allocation7], %s941_s11  ;;  %s985_s22 = sshll.u32 %s1322_s18, 11 }
  0x5c   : > { %v1147_v1 = vld [vmem:[#allocation5] sm:$0xff]   ;;  %986 = vmatprep.subr.bf16.mxu0 %v1146_v0  ;;  %1050 = vmatprep.subr.bf16.mxu1 %v1146_v0  ;;  %v1149_v3 = vld [vmem:[#allocation5 + $0x8] sm:$0xff]   ;;  %v1150_v4 = vld [vmem:[#allocation5 + $0x50] sm:$0xff]   ;;  %s802_s28 = sshll.u32 %s1569_s21, 4  ;;  %s1612_s30 = scalar_lea.hbm %s1670_s4, %s985_s22  ;;  %s1614_s28 = int_to_ptr.vmem [resolvable:$true] %s802_s28 }
  0x5d   : > { %987 = vmatpush3.bf16.msra.mxu0 %v1147_v1  ;;  %1058 = vmatpush3.bf16.msra.mxu1 %v1147_v1  ;;  %v1151_v5 = vld [vmem:[#allocation5 + $0x10] sm:$0xff]   ;;  %v1152_v6 = vld [vmem:[#allocation5 + $0x58] sm:$0xff]   ;;  %v1154_v8 = vld [vmem:[#allocation5 + $0x60] sm:$0xff]   ;;  %s788_s18 = scalar_lea.sflag [#allocation4], %s1517_s7  ;;  %s1244_s6 = scalar_lea.vmem %s1614_s28, 2048 }
  0x5e   : > { %988 = vmatprep.subr.bf16.mxu0 %v1148_v2  ;;  %1051 = vmatprep.subr.bf16.mxu1 %v1148_v2  ;;  %v1153_v7 = vld [vmem:[#allocation5 + $0x18] sm:$0xff]   ;;  %v1155_v9 = vld [vmem:[#allocation5 + $0x20] sm:$0xff]   ;;  %v1156_v10 = vld [vmem:[#allocation5 + $0x68] sm:$0xff]   ;;  %p1245_p4 = scmp.ne.s32.totalorder %s1614_s28, %s1244_s6  ;;  %s1338_s9 = smov [#allocation7]  }
  0x5f   : > { %v1164_v11 = vld [vmem:[%s1523_s29 + $0x4] ss:$8 sps:$4 sm:$0xff]   ;;  %v1158_v14 = vld [vmem:[#allocation5 + $0x70] sm:$0xff]   ;;  %v1160_v16 = vld [vmem:[#allocation5 + $0x78] sm:$0xff]   ;;  %s1248_s11 = sshll.u32 %s1338_s9, 4  ;;  %s1249_s11 = int_to_ptr.vmem [resolvable:$false] %s1248_s11 }
  0x60   : > { %v1167_v12 = vld [vmem:[%s1523_s29 + $0x44] ss:$8 sps:$4 sm:$0xff]   ;;  %593 = vmatprep.mubr.bf16.mxu0 %v1164_v11  ;;  %v1159_v15 = vld [vmem:[#allocation5 + $0x30] sm:$0xff]   ;;  %v1161_v17 = vld [vmem:[#allocation5 + $0x38] sm:$0xff]   ;;  %p1246_p6 = pnand %p1245_p4, %p1461_p11  ;;  %s1250_s12 = scalar_lea.vmem %s1249_s11, 4096 }
  0x61   : > { %989 = vmatpush3.bf16.msra.mxu0 %v1149_v3  ;;  %1059 = vmatpush3.bf16.msra.mxu1 %v1149_v3  ;;  %v1157_v13 = vld [vmem:[#allocation5 + $0x28] sm:$0xff]   ;;  %v1168_v20 = vld [vmem:[%s1523_s29 + $0x14] ss:$8 sps:$4 sm:$0xff]   ;;  %v1172_v22 = vld [vmem:[%s1523_s29 + $0x10] ss:$8 sps:$4 sm:$0xff]   ;;  %p1251_p12 = scmp.lt.s32.totalorder %s1614_s28, %s1249_s11  ;;  %p1252_p10 = scmp.lt.s32.totalorder %s1250_s12, %s1244_s6 }
  0x62   : > { %990 = vmatprep.subr.bf16.mxu0 %v1150_v4  ;;  %1052 = vmatprep.subr.bf16.mxu1 %v1150_v4  ;;  %v1162_v18 = vld [vmem:[%s1523_s29] ss:$8 sps:$4 sm:$0xff]   ;;  %v1170_v21 = vld [vmem:[%s1523_s29 + $0x54] ss:$8 sps:$4 sm:$0xff]   ;;  %v1173_v23 = vld [vmem:[%s1523_s29 + $0x50] ss:$8 sps:$4 sm:$0xff]   ;;  %p1247_p8 = pneg %p1246_p6 }
  0x63   : > { %625 = vmatprep.mubr.bf16.mxu1 %v1167_v12  ;;  %v1165_v19 = vld [vmem:[%s1523_s29 + $0x40] ss:$8 sps:$4 sm:$0xff]   ;;  %v1174_v24 = vld [vmem:[%s1523_s29 + $0x24] ss:$8 sps:$4 sm:$0xff]   ;;  %v1180_v28 = vld [vmem:[%s1523_s29 + $0x34] ss:$8 sps:$4 sm:$0xff]   ;;  %p1253_p0 = por %p1252_p10, %p1251_p12 }
  0x64   : > { %v1176_v25 = vld [vmem:[%s1523_s29 + $0x64] ss:$8 sps:$4 sm:$0xff]   ;;  %v1178_v26 = vld [vmem:[%s1523_s29 + $0x20] ss:$8 sps:$4 sm:$0xff]   ;;  %v1182_v29 = vld [vmem:[%s1523_s29 + $0x74] ss:$8 sps:$4 sm:$0xff]  }
  0x65   : > { %991 = vmatpush3.bf16.msra.mxu0 %v1151_v5  ;;  %1060 = vmatpush3.bf16.msra.mxu1 %v1151_v5  ;;  %v1179_v27 = vld [vmem:[%s1523_s29 + $0x60] ss:$8 sps:$4 sm:$0xff]   ;;  %v1184_v30 = vld [vmem:[%s1523_s29 + $0x30] ss:$8 sps:$4 sm:$0xff]   ;;  %p1254_p5 = pnand %p1253_p0, %p1247_p8 }
  0x66   : > { %992 = vmatprep.subr.bf16.mxu0 %v1152_v6  ;;  %1053 = vmatprep.subr.bf16.mxu1 %v1152_v6  ;;  %v1185_v31 = vld [vmem:[%s1523_s29 + $0x70] ss:$8 sps:$4 sm:$0xff]   ;;  %v1552_v40 = vld [vmem:[%s1668_s2] ss:$0 sm:$0xff] }
  0x67   : > { %v1557_v45 = vld [vmem:[%s1669_s3] ss:$0 sm:$0xff] }
  0x69   : > { %993 = vmatpush3.bf16.msra.mxu0 %v1153_v7  ;;  %1061 = vmatpush3.bf16.msra.mxu1 %v1153_v7 }
  0x6a   : > { %994 = vmatprep.subr.bf16.mxu0 %v1154_v8  ;;  %1054 = vmatprep.subr.bf16.mxu1 %v1154_v8 }
  0x6d   : > { %995 = vmatpush3.bf16.msra.mxu0 %v1155_v9  ;;  %1062 = vmatpush3.bf16.msra.mxu1 %v1155_v9 }
  0x6e   : > { %996 = vmatprep.subr.bf16.mxu0 %v1156_v10  ;;  %1055 = vmatprep.subr.bf16.mxu1 %v1156_v10 }
  0x71   : > { %997 = vmatpush3.bf16.msra.mxu0 %v1157_v13  ;;  %1063 = vmatpush3.bf16.msra.mxu1 %v1157_v13 }
  0x72   : > { %998 = vmatprep.subr.bf16.mxu0 %v1158_v14  ;;  %1056 = vmatprep.subr.bf16.mxu1 %v1158_v14 }
  0x75   : > { %999 = vmatpush3.bf16.msra.mxu0 %v1159_v15  ;;  %1064 = vmatpush3.bf16.msra.mxu1 %v1159_v15 }
  0x76   : > { %1000 = vmatprep.subr.bf16.mxu0 %v1160_v16  ;;  %1057 = vmatprep.subr.bf16.mxu1 %v1160_v16 }
  0x79   : > { %1001 = vmatpush3.bf16.msra.mxu0 %v1161_v17  ;;  %1065 = vmatpush3.bf16.msra.mxu1 %v1161_v17 }
  0x7c   : > { %594 = vmatmul.mubr.bf16.vlgmr.msra.gmra.mrb[0].mxu0 %v1162_v18  ;;  %626 = vmatmul.mubr.bf16.vlgmr.msra.gmra.mrb[0].mxu1 %v1165_v19 }
  0x7d   : > { %601 = vmatprep.mubr.bf16.mxu0 %v1168_v20  ;;  %633 = vmatprep.mubr.bf16.mxu1 %v1170_v21 }
  0x84   : > { %602 = vmatmul.mubr.bf16.gmra.mrb[4].mxu0 %v1172_v22  ;;  %634 = vmatmul.mubr.bf16.gmra.mrb[4].mxu1 %v1173_v23 }
  0x85   : > { %609 = vmatprep.mubr.bf16.mxu0 %v1174_v24  ;;  %641 = vmatprep.mubr.bf16.mxu1 %v1176_v25 }
  0x8c   : > { %610 = vmatmul.mubr.bf16.gmra.mrb[8].mxu0 %v1178_v26  ;;  %642 = vmatmul.mubr.bf16.gmra.mrb[8].mxu1 %v1179_v27 }
  0x8d   : > { %617 = vmatprep.mubr.bf16.mxu0 %v1180_v28  ;;  %649 = vmatprep.mubr.bf16.mxu1 %v1182_v29 }
  0x94   : > { %618 = vmatmul.mubr.bf16.gmra.mrb[12].mxu0 %v1184_v30  ;;  %650 = vmatmul.mubr.bf16.gmra.mrb[12].mxu1 %v1185_v31 }
 0x14f   : > { %v1002_v32 = vpop.f32.mrb[0].mxu0  ;;  %v1026_v33 = vpop.f32.mrb[0].mxu1 }
 0x150   : > { %v1003_v34 = vpop.f32.mrb[1].mxu0  ;;  %v1027_v35 = vpop.f32.mrb[1].mxu1 }
 0x151   : > { %v1004_v36 = vadd.f32 %v1003_v34, %v1002_v32  ;;  %v1028_v37 = vadd.f32 %v1027_v35, %v1026_v33  ;;  %v1005_v38 = vpop.f32.mrb[2].mxu0  ;;  %v1029_v39 = vpop.f32.mrb[2].mxu1 }
 0x152   : > { %v1006_v41 = vpop.f32.mrb[3].mxu0  ;;  %v1030_v42 = vpop.f32.mrb[3].mxu1 }
 0x153   : > { %v1007_v43 = vadd.f32 %v1006_v41, %v1005_v38  ;;  %v1031_v44 = vadd.f32 %v1030_v42, %v1029_v39  ;;  %v716_v46 = vmul.f32 %v1004_v36, %v1552_v40  ;;  %v724_v47 = vmul.f32 %v1028_v37, %v1552_v40 }
 0x155   : > { %v739_v48 = vadd.f32 %v1557_v45, %v716_v46  ;;  %v747_v49 = vadd.f32 %v1557_v45, %v724_v47  ;;  %v717_v50 = vmul.f32 %v1007_v43, %v1552_v40  ;;  %v725_v51 = vmul.f32 %v1031_v44, %v1552_v40 }
 0x157   : > { %v1008_v52 = vpop.f32.mrb[4].mxu0  ;;  %v1032_v53 = vpop.f32.mrb[4].mxu1  ;;  %v755_v56 = vmax.f32 %v739_v48, 0.0  ;;  %v763_v57 = vmax.f32 %v747_v49, 0.0  ;;  %v740_v58 = vadd.f32 %v1557_v45, %v717_v50  ;;  %v748_v59 = vadd.f32 %v1557_v45, %v725_v51 }
 0x158   : > { %v1009_v54 = vpop.f32.mrb[5].mxu0  ;;  %v1033_v55 = vpop.f32.mrb[5].mxu1 }
 0x159   : > { %v1011_v60 = vpop.f32.mrb[6].mxu0  ;;  %v1035_v61 = vpop.f32.mrb[6].mxu1  ;;  %v1010_v62 = vadd.f32 %v1009_v54, %v1008_v52  ;;  %v1034_v63 = vadd.f32 %v1033_v55, %v1032_v53  ;;  %771 = vst [vmem:[%s1569_s21] sm:$0xff] %v755_v56  ;;  %779 = vst [vmem:[%s1569_s21 + $0x40] sm:$0xff] %v763_v57  ;;  %v756_v2 = vmax.f32 %v740_v58, 0.0  ;;  %v764_v3 = vmax.f32 %v748_v59, 0.0 }
 0x15a   : > { %v1012_v0 = vpop.f32.mrb[7].mxu0  ;;  %v1036_v1 = vpop.f32.mrb[7].mxu1 }
 0x15b   : > { %v1013_v4 = vadd.f32 %v1012_v0, %v1011_v60  ;;  %v1037_v5 = vadd.f32 %v1036_v1, %v1035_v61  ;;  %772 = vst [vmem:[%s1569_s21 + $0x8] sm:$0xff] %v756_v2  ;;  %780 = vst [vmem:[%s1569_s21 + $0x48] sm:$0xff] %v764_v3  ;;  %v718_v6 = vmul.f32 %v1010_v62, %v1552_v40 }
 0x15c   : > { %v726_v7 = vmul.f32 %v1034_v63, %v1552_v40 }
 0x15d   : > { %v719_v8 = vmul.f32 %v1013_v4, %v1552_v40  ;;  %v727_v9 = vmul.f32 %v1037_v5, %v1552_v40  ;;  %v741_v12 = vadd.f32 %v1557_v45, %v718_v6 }
 0x15e   : > { %v749_v13 = vadd.f32 %v1557_v45, %v726_v7 }
 0x15f   : > { %v1014_v10 = vpop.f32.mrb[8].mxu0  ;;  %v1038_v11 = vpop.f32.mrb[8].mxu1  ;;  %v742_v16 = vadd.f32 %v1557_v45, %v719_v8  ;;  %v750_v17 = vadd.f32 %v1557_v45, %v727_v9  ;;  %v757_v22 = vmax.f32 %v741_v12, 0.0 }
 0x160   : > { %v1015_v14 = vpop.f32.mrb[9].mxu0  ;;  %v1039_v15 = vpop.f32.mrb[9].mxu1  ;;  %v765_v23 = vmax.f32 %v749_v13, 0.0 }
 0x161   : > { %v1016_v18 = vadd.f32 %v1015_v14, %v1014_v10  ;;  %v1040_v19 = vadd.f32 %v1039_v15, %v1038_v11  ;;  %v1017_v20 = vpop.f32.mrb[10].mxu0  ;;  %v1041_v21 = vpop.f32.mrb[10].mxu1  ;;  %v758_v26 = vmax.f32 %v742_v16, 0.0  ;;  %v766_v27 = vmax.f32 %v750_v17, 0.0  ;;  %773 = vst [vmem:[%s1569_s21 + $0x10] sm:$0xff] %v757_v22 }
 0x162   : > { %v1018_v24 = vpop.f32.mrb[11].mxu0  ;;  %v1042_v25 = vpop.f32.mrb[11].mxu1  ;;  %781 = vst [vmem:[%s1569_s21 + $0x50] sm:$0xff] %v765_v23 }
 0x163   : > { %v1019_v28 = vadd.f32 %v1018_v24, %v1017_v20  ;;  %v1043_v29 = vadd.f32 %v1042_v25, %v1041_v21  ;;  %774 = vst [vmem:[%s1569_s21 + $0x18] sm:$0xff] %v758_v26  ;;  %782 = vst [vmem:[%s1569_s21 + $0x58] sm:$0xff] %v766_v27  ;;  %v720_v30 = vmul.f32 %v1016_v18, %v1552_v40 }
 0x164   : > { %v728_v31 = vmul.f32 %v1040_v19, %v1552_v40 }
 0x165   : > { %v743_v32 = vadd.f32 %v1557_v45, %v720_v30  ;;  %v721_v36 = vmul.f32 %v1019_v28, %v1552_v40  ;;  %v729_v37 = vmul.f32 %v1043_v29, %v1552_v40 }
 0x166   : > { %v751_v33 = vadd.f32 %v1557_v45, %v728_v31 }
 0x167   : > { %v1020_v34 = vpop.f32.mrb[12].mxu0  ;;  %v1044_v35 = vpop.f32.mrb[12].mxu1  ;;  %v759_v41 = vmax.f32 %v743_v32, 0.0  ;;  %v744_v48 = vadd.f32 %v1557_v45, %v721_v36  ;;  %v752_v49 = vadd.f32 %v1557_v45, %v729_v37 }
 0x168   : > { %v1021_v38 = vpop.f32.mrb[13].mxu0  ;;  %v1045_v39 = vpop.f32.mrb[13].mxu1  ;;  %v767_v42 = vmax.f32 %v751_v33, 0.0 }
 0x169   : > { %v1022_v43 = vadd.f32 %v1021_v38, %v1020_v34  ;;  %v1046_v44 = vadd.f32 %v1045_v39, %v1044_v35  ;;  %v1023_v46 = vpop.f32.mrb[14].mxu0  ;;  %v1047_v47 = vpop.f32.mrb[14].mxu1  ;;  %775 = vst [vmem:[%s1569_s21 + $0x20] sm:$0xff] %v759_v41  ;;  %v760_v54 = vmax.f32 %v744_v48, 0.0  ;;  %v768_v55 = vmax.f32 %v752_v49, 0.0 }
 0x16a   : > { %v1024_v50 = vpop.f32.mrb[15].mxu0  ;;  %v1048_v51 = vpop.f32.mrb[15].mxu1  ;;  %783 = vst [vmem:[%s1569_s21 + $0x60] sm:$0xff] %v767_v42 }
 0x16b   : > { %v1025_v52 = vadd.f32 %v1024_v50, %v1023_v46  ;;  %v1049_v53 = vadd.f32 %v1048_v51, %v1047_v47  ;;  %v722_v56 = vmul.f32 %v1022_v43, %v1552_v40  ;;  %v730_v57 = vmul.f32 %v1046_v44, %v1552_v40  ;;  %776 = vst [vmem:[%s1569_s21 + $0x28] sm:$0xff] %v760_v54 }
 0x16c   : > { %784 = vst [vmem:[%s1569_s21 + $0x68] sm:$0xff] %v768_v55 }
 0x16d   : > { %v745_v58 = vadd.f32 %v1557_v45, %v722_v56  ;;  %v753_v59 = vadd.f32 %v1557_v45, %v730_v57  ;;  %v723_v60 = vmul.f32 %v1025_v52, %v1552_v40  ;;  %v731_v61 = vmul.f32 %v1049_v53, %v1552_v40 }
 0x16f   : > { %v761_v62 = vmax.f32 %v745_v58, 0.0  ;;  %v769_v63 = vmax.f32 %v753_v59, 0.0  ;;  %v746_v0 = vadd.f32 %v1557_v45, %v723_v60  ;;  %v754_v1 = vadd.f32 %v1557_v45, %v731_v61 }
 0x171   : > { %777 = vst [vmem:[%s1569_s21 + $0x30] sm:$0xff] %v761_v62  ;;  %785 = vst [vmem:[%s1569_s21 + $0x70] sm:$0xff] %v769_v63  ;;  %v762_v40 = vmax.f32 %v746_v0, 0.0  ;;  %v770_v2 = vmax.f32 %v754_v1, 0.0 }
 0x173   : > { %778 = vst [vmem:[%s1569_s21 + $0x38] sm:$0xff] %v762_v40  ;;  %786 = vst [vmem:[%s1569_s21 + $0x78] sm:$0xff] %v770_v2 }
 0x174   : > { %1257 = shalt.err (!%p1254_p5)
}
 0x175   : > { %s1258_s29 = scalar_lea.hbm %s1612_s30, 2048  ;;  %s1262_s27 = scalar_lea.hbm %s1670_s4, 8192 }
 0x176   : > { %p1259_p9 = scmp.ne.s32.totalorder %s1612_s30, %s1258_s29  ;;  %p1263_p3 = scmp.lt.u32.totalorder %s1612_s30, %s1670_s4 }
 0x177   : > { %p1264_p7 = scmp.lt.u32.totalorder %s1262_s27, %s1258_s29  ;;  %p1266_p4 = scmp.lt.u32.totalorder %s1258_s29, %s1612_s30 }
 0x178   : > { %p1260_p1 = pnand %p1259_p9, %p1461_p11 }
 0x179   : > { %p1265_p13 = por %p1264_p7, %p1263_p3 }
 0x17a   : > { %p1261_p2 = pneg %p1260_p1 }
 0x17b   : > { %p1267_p6 = por %p1266_p4, %p1265_p13 }
 0x17d   : > { %p1268_p8 = pnand %p1267_p6, %p1261_p2 }
 0x17f   : > { %1271 = shalt.err (!%p1268_p8)
}
 0x180   : > { %s1339_s22 = smov 128   ;;  %s1340_s13 = smov 8  }
 0x181   : > { %1072 = dma.vmem_to_hbm [thread:$0]  (%p1461_p11), %s1614_s28, 2048, %s1612_s30, %s788_s18, %s1339_s22, %s1339_s22, %s1340_s13  }
 0x182 PF: > { %p1089_p12 = scmp.ge.s32.totalorder %s1330_s20, 2  ;;  %s817_s24 = sand.u32 1, %s1310_s15  }
 0x183   : > { %p1688_p10 = scmp.ne.s32.totalorder %s1678_s26, 0  ;;  %s818_s6 = scalar_lea.sflag [#allocation4], %s817_s24 }
 0x185   : > { %p1083_p0 = pnand %p1089_p12, %p1688_p10 }
 0x187   : > { %1305 = dma.done.wait (!%p1083_p0), %s818_s6, 2048  }
 0x188   : > { %1307 = vsyncadd (!%p1083_p0), %s818_s6, 4294965248  ;;  %s21_s20 = sadd.s32 1, %s1330_s20   ;;  %s1689_s15 = smov %s1314_s16 }
 0x189   : > { %p18_p5 = scmp.ge.s32.totalorder %s21_s20, 6   ;;  %s1690_s16 = smov %s1318_s17 }
 0x18a   : > { %s1691_s17 = smov %s1470_s10  ;;  %s1692_s18 = smov %s1326_s19 }
 0x18b   : > { %s1693_s19 = smov %s1695_s5  ;;  %20 = sbr.rel (!%p18_p5) target bundleno = 7 (0x7), region = 100 }
 0x192   :  { %823 = vsyncpa [#allocation3], 1 }
 0x193   :  { %825 = vsyncpa [#allocation3 + $0x1], 1 }
 0x194   :  { %826 = vsyncpa [#allocation6], 1 }
 0x195   :  { %827 = vsyncpa [#allocation4], 1 }
 0x196   :  { %829 = vsyncpa [#allocation4 + $0x1], 1 }

</bundles_post_ra>
